<compile_context>
chip_gen: v6e
topology: v6e:2x2x1
jax: 0.10.0
libtpu: 0.0.40
codegen_flags: <defaults>
</compile_context>

<pallas_src>
import functools

import jax
import jax.numpy as jnp
from jax.experimental import pallas as pl
from jax.experimental.pallas import tpu as pltpu


def _round_up(x, m):
    return -(-x // m) * m


def _pick_hw_tile(hw, c_half, itemsize, budget_bytes=2 * 1024 * 1024):
    """Lane-dense (multiple-of-128) H*W tile whose (c_half, tile) block fits budget."""
    hw_128 = _round_up(hw, 128)
    max_lanes = (budget_bytes // (max(c_half, 1) * max(itemsize, 1))) // 128 * 128
    return int(min(hw_128, max(max_lanes, 128)))


def _inner_cos_kernel(*refs, target_mode, target_val, needs_tail_mask, hw_valid, hw_tile):
    if target_mode == "tensor":
        former_ref, mask_ref, target_ref, loss_ref = refs
    elif target_mode == "smem":
        former_ref, mask_ref, tsc_ref, loss_ref = refs
    else:  # "static"
        former_ref, mask_ref, loss_ref = refs

    former = former_ref[0, 0].astype(jnp.float32)          # (c_half, hw_tile)
    maskv = mask_ref[0].astype(jnp.float32)                # (1, hw_tile) -> bcast sublanes

    if target_mode == "tensor":
        target = target_ref[0, 0].astype(jnp.float32)      # (c_half, hw_tile)
    elif target_mode == "smem":
        target = tsc_ref[0]                                 # runtime f32 scalar from SMEM
    else:
        target = jnp.float32(target_val)                    # compile-time constant

    diff = former * maskv - target
    sq = diff * diff

    if needs_tail_mask:
        # Zero the zero-padded lanes past the true H*W extent (scalar-target pad
        # contributes target**2 otherwise).
        t = pl.program_id(1)
        lane = jax.lax.broadcasted_iota(jnp.int32, sq.shape, 1)
        sq = jnp.where(t * hw_tile + lane < hw_valid, sq, jnp.float32(0.0))

    # One cross-lane/sublane reduce per step (XLU), lane-dense full-vreg store.
    partial = jnp.sum(sq)
    loss_ref[...] = jnp.broadcast_to(partial, loss_ref.shape).astype(jnp.float32)


def inner_cos_forward(x_nchw, mask_nchw, *, strength=1.0, target=1.0):
    """Pallas implementation of InnerCos.forward (skip=0).

    Returns (output, new_target, loss):
      output     : x_nchw (identity pass-through, never touches the kernel)
      new_target : x_nchw[:, C//2:, :, :] (lazy slice; never touches the kernel)
      loss       : strength * mean((mask * x[:, :C//2] - target)^2), scalar f32.
                   `target` may be a scalar (first pass), a (B, C//2, H, W) tensor,
                   or the full previous activation (B, C, H, W) — in the last case the
                   latter half is read directly from it (zero-copy).
    """
    B, C, H, W = x_nchw.shape
    assert C % 2 == 0, "InnerCos splits channels in half; C must be even"
    c_half = C // 2
    HW = H * W

    hw_tile = _pick_hw_tile(HW, c_half, jnp.dtype(x_nchw.dtype).itemsize)
    HW_p = _round_up(HW, hw_tile)
    n_t = HW_p // hw_tile
    pad = HW_p - HW
    needs_tail_mask = pad > 0

    def _pad_last(a):
        if pad == 0:
            return a
        cfg = [(0, 0)] * (a.ndim - 1) + [(0, pad)]
        return jnp.pad(a, cfg)

    # ---- classify target: tensor vs scalar (concrete vs traced) -----------------
    target_mode = "static"
    target_val = 1.0
    target_arr = None
    t_group = 0
    if hasattr(target, "ndim") and getattr(target, "ndim", 0) >= 2:
        tgt = jnp.asarray(target)
        assert tgt.ndim == 4 and tgt.shape[0] == B and tuple(tgt.shape[2:]) == (H, W), \
            "tensor target must be (B, C//2, H, W) or (B, C, H, W)"
        target_mode = "tensor"
        if tgt.shape[1] == C and pad == 0:
            # Zero-copy: read the latter half straight out of the previous activation.
            target_arr = tgt.reshape(B, 2, c_half, HW)
            t_group = 1
        else:
            if tgt.shape[1] == C:
                tgt = tgt[:, c_half:]
            assert tgt.shape[1] == c_half
            target_arr = _pad_last(tgt.reshape(B, 1, c_half, HW))
            t_group = 0
    else:
        try:
            target_val = float(target)            # python / numpy / concrete jnp scalar
            target_mode = "static"
        except (TypeError, jax.errors.ConcretizationTypeError):
            target_mode = "smem"                  # traced scalar -> tiny SMEM ref

    # ---- inputs: only the former channel-half is ever DMA'd ---------------------
    if pad == 0:
        x_former = x_nchw.reshape(B, 2, c_half, HW)           # free contiguous reshape
    else:
        x_former = _pad_last(x_nchw[:, :c_half].reshape(B, 1, c_half, HW))
    m3 = _pad_last(mask_nchw.reshape(B, 1, HW))                # native dtype, cast in kernel

    in_specs = [
        pl.BlockSpec((1, 1, c_half, hw_tile), lambda b, t: (b, 0, 0, t)),   # former half
        pl.BlockSpec((1, 1, hw_tile), lambda b, t: (b, 0, t)),              # mask
    ]
    inputs = [x_former, m3]
    if target_mode == "tensor":
        in_specs.append(
            pl.BlockSpec((1, 1, c_half, hw_tile), lambda b, t, g=t_group: (b, g, 0, t)))
        inputs.append(target_arr)
    elif target_mode == "smem":
        in_specs.append(pl.BlockSpec(memory_space=pltpu.MemorySpace.SMEM))
        inputs.append(jnp.asarray(target, jnp.float32).reshape(1))

    kernel = functools.partial(
        _inner_cos_kernel,
        target_mode=target_mode,
        target_val=target_val,
        needs_tail_mask=needs_tail_mask,
        hw_valid=HW,
        hw_tile=hw_tile,
    )

    loss_tiles = pl.pallas_call(
        kernel,
        out_shape=jax.ShapeDtypeStruct((B, n_t, 8, 128), jnp.float32),
        grid_spec=pltpu.PrefetchScalarGridSpec(
            num_scalar_prefetch=0,
            grid=(B, n_t),
            in_specs=in_specs,
            out_specs=pl.BlockSpec((1, 1, 8, 128), lambda b, t: (b, t, 0, 0)),
        ),
        compiler_params=pltpu.CompilerParams(
            dimension_semantics=("parallel", "parallel"),   # no carry -> fully parallel
            vmem_limit_bytes=64 * 1024 * 1024,
        ),
    )(*inputs)

    denom = jnp.float32(B * c_half * HW)
    loss = jnp.asarray(strength, jnp.float32) * jnp.sum(loss_tiles[:, :, 0, 0]) / denom

    # Identity pass-through + lazy latter-half target: neither moves through the kernel.
    new_target = x_nchw[:, c_half:, :, :]
    # TODO(synk): util.cal_feat_mask / _split_mask preprocessing and the autograd
    # backward gradient injection (InnerCosFunction.backward) are outside this forward.
    return x_nchw, new_target, loss


if __name__ == "__main__":
    key = jax.random.PRNGKey(0)
    k_x1, k_x2, k_m = jax.random.split(key, 3)

    B, C, H, W = 2, 4, 16, 16
    x1 = jax.random.normal(k_x1, (B, C, H, W), dtype=jnp.float32)
    x2 = jax.random.normal(k_x2, (B, C, H, W), dtype=jnp.float32)
    # Synthetic binary feature mask (as util.cal_feat_mask would produce), shape (B,1,H,W).
    mask = (jax.random.uniform(k_m, (B, 1, H, W)) > 0.5).astype(jnp.float32)

    strength = 1.0

    # --- first forward pass: scalar target 1.0 (module __init__ state) ---
    out1, tgt1, loss1 = inner_cos_forward(x1, mask, strength=strength, target=1.0)
    jax.block_until_ready((out1, tgt1, loss1))

    assert jnp.array_equal(out1, x1), "output must be a pass-through of in_data"
    assert jnp.allclose(tgt1, x1[:, C // 2:, :, :]), "target must be latter-half channels"
    ref1 = strength * jnp.mean((x1[:, : C // 2] * mask - 1.0) ** 2)
    assert jnp.allclose(loss1, ref1, rtol=1e-5, atol=1e-5), "MSE mismatch (scalar target)"

    # --- second forward pass: tensor target = previously saved latter-half channels ---
    out2, tgt2, loss2 = inner_cos_forward(x2, mask, strength=strength, target=tgt1)
    jax.block_until_ready((out2, tgt2, loss2))

    assert jnp.array_equal(out2, x2)
    assert jnp.allclose(tgt2, x2[:, C // 2:, :, :])
    ref2 = strength * jnp.mean((x2[:, : C // 2] * mask - tgt1) ** 2)
    assert jnp.allclose(loss2, ref2, rtol=1e-5, atol=1e-5), "MSE mismatch (tensor target)"

    # --- second pass, zero-copy variant: hand the full previous activation as target;
    #     the kernel reads its latter half straight from HBM (no slice materialized). ---
    _, _, loss2b = inner_cos_forward(x2, mask, strength=strength, target=x1)
    jax.block_until_ready(loss2b)
    assert jnp.allclose(loss2b, ref2, rtol=1e-5, atol=1e-5), "MSE mismatch (full-x target)"

    print("KERNEL_OK")
</pallas_src>

<mosaic_0001>
module attributes {stable_mosaic.version = 11 : i64} {
  func.func @_inner_cos_kernel(%arg0: i32, %arg1: i32, %arg2: memref<1x1x2x256xf32, #tpu.memory_space<vmem>>, %arg3: memref<1x1x256xf32, #tpu.memory_space<vmem>>, %arg4: memref<1x1x8x128xf32, #tpu.memory_space<vmem>>) attributes {dimension_semantics = [#tpu.dimension_semantics<parallel>, #tpu.dimension_semantics<parallel>], iteration_bounds = array<i64: 2, 1>, scalar_prefetch = 0 : i64, scratch_operands = 0 : i64, tpu.core_type = #tpu.core_type<tc>, window_params = [{transform_indices = @transform_0, window_bounds = array<i64: 1, 1, 2, 256>}, {transform_indices = @transform_1, window_bounds = array<i64: 1, 1, 256>}, {transform_indices = @transform_2, window_bounds = array<i64: 1, 1, 8, 128>}]} {
    %c0 = arith.constant 0 : index
    %c0_0 = arith.constant 0 : index
    %c0_1 = arith.constant 0 : index
    %c0_2 = arith.constant 0 : index
    %0 = vector.load %arg2[%c0, %c0_0, %c0_1, %c0_2] : memref<1x1x2x256xf32, #tpu.memory_space<vmem>>, vector<1x1x2x256xf32>
    %1 = vector.shape_cast %0 : vector<1x1x2x256xf32> to vector<2x256xf32>
    %c0_3 = arith.constant 0 : index
    %c0_4 = arith.constant 0 : index
    %c0_5 = arith.constant 0 : index
    %2 = vector.load %arg3[%c0_3, %c0_4, %c0_5] : memref<1x1x256xf32, #tpu.memory_space<vmem>>, vector<1x1x256xf32>
    %3 = vector.shape_cast %2 : vector<1x1x256xf32> to vector<1x256xf32>
    %4 = vector.broadcast %3 : vector<1x256xf32> to vector<2x256xf32>
    %5 = arith.mulf %1, %4 : vector<2x256xf32>
    %cst = arith.constant 1.000000e+00 : f32
    %6 = vector.broadcast %cst : f32 to vector<2x256xf32>
    %7 = arith.subf %5, %6 : vector<2x256xf32>
    %8 = arith.mulf %7, %7 : vector<2x256xf32>
    %9 = vector.shape_cast %8 : vector<2x256xf32> to vector<1x2x256xf32>
    %cst_6 = arith.constant dense<0.000000e+00> : vector<1xf32>
    %10 = vector.multi_reduction <add>, %9, %cst_6 [1, 2] : vector<1x2x256xf32> to vector<1xf32>
    %11 = vector.shape_cast %10 : vector<1xf32> to vector<1x1x1xf32>
    %12 = vector.extract %11[0, 0, 0] : f32 from vector<1x1x1xf32>
    %13 = vector.broadcast %12 : f32 to vector<1x1x8x128xf32>
    %c0_7 = arith.constant 0 : index
    %c0_8 = arith.constant 0 : index
    %c0_9 = arith.constant 0 : index
    %c0_10 = arith.constant 0 : index
    %14 = vector.load %arg4[%c0_7, %c0_8, %c0_9, %c0_10] : memref<1x1x8x128xf32, #tpu.memory_space<vmem>>, vector<1x1x8x128xf32>
    tpu.vector_store %arg4[%c0_7, %c0_8, %c0_9, %c0_10], %13 {strides = array<i32>} : memref<1x1x8x128xf32, #tpu.memory_space<vmem>>, vector<1x1x8x128xf32>,
    return
  }
  func.func @transform_0(%arg0: i32, %arg1: i32) -> (i32, i32, i32, i32) {
    %c0_i32 = arith.constant 0 : i32
    %c0_i32_0 = arith.constant 0 : i32
    %c0_i32_1 = arith.constant 0 : i32
    return %arg0, %c0_i32, %c0_i32_0, %arg1 : i32, i32, i32, i32
  }
  func.func @transform_1(%arg0: i32, %arg1: i32) -> (i32, i32, i32) {
    %c0_i32 = arith.constant 0 : i32
    %c0_i32_0 = arith.constant 0 : i32
    return %arg0, %c0_i32, %arg1 : i32, i32, i32
  }
  func.func @transform_2(%arg0: i32, %arg1: i32) -> (i32, i32, i32, i32) {
    %c0_i32 = arith.constant 0 : i32
    %c0_i32_0 = arith.constant 0 : i32
    %c0_i32_1 = arith.constant 0 : i32
    return %arg0, %arg1, %c0_i32, %c0_i32_0 : i32, i32, i32, i32
  }
}

</mosaic_0001>

<bundles_post_ra>
// kernel: tpu_custom_call.1
= control target key start
LH: loop header
LB: loop body
LE: loop exit
PB: predicated region body
PF: predicated region fallthrough
CT: control target
= control target key end

     0   :  { %7 = vsyncpa [#allocation3], 0  ;;  %s817_s0 = inlined_call_operand.hbm [shape: f32[2,2,2,256], index: 0, kind: input, shape index: {}]   ;;  %s818_s1 = inlined_call_operand.hbm [shape: f32[2,1,256], index: 1, kind: input, shape index: {}]   ;;  %s819_s2 = inlined_call_operand.hbm [shape: f32[2,1,8,128], index: 2, kind: output, shape index: {}]  }
   0x1   :  { %9 = vsyncpa [#allocation3 + $0x1], 0 }
   0x2   :  { %10 = vsyncpa [#allocation6], 0 }
   0x3   :  { %12 = vsyncpa [#allocation6 + $0x1], 0 }
   0x4   :  { %13 = vsyncpa [#allocation4], 0 }
   0x5   :  { %15 = vsyncpa [#allocation4 + $0x1], 0  ;;  %s646_s9 = smov 0   ;;  %s648_s10 = smov 0  }
   0x6   :  { %s650_s11 = smov 0   ;;  %s652_s12 = smov 0  }
   0x7   :  { %s654_s13 = smov 0   ;;  %s656_s14 = smov 0  }
   0x8 LB: > { %s394_s15 = sadd.s32 4294967295, %s625_s14   ;;  %s395_s16 = sadd.s32 4294967294, %s625_s14   ;;  %s625_s14 = sphi %s656_s14, %s21_s14   ;;  %s621_s13 = sphi %s654_s13, %s831_s13   ;;  %s617_s12 = sphi %s652_s12, %s830_s12   ;;  %s613_s11 = sphi %s650_s11, %s829_s11   ;;  %s609_s10 = sphi %s648_s10, %s828_s10   ;;  %s605_s9 = sphi %s646_s9, %s827_s9  }
   0x9   : > { %s33_s17 = sadd.s32 1, %s621_s13  ;;  %s42_s18 = sadd.s32 1, %s613_s11 }
   0xa   : > { %p35_p0 = scmp.ge.s32.totalorder %s33_s17, 2  ;;  %p49_p1 = scmp.ne.s32.totalorder %s613_s11, %s609_s10 }
   0xb   : > { %p50_p2 = scmp.eq.s32.totalorder %s625_s14, 0  ;;  %p55_p3 = scmp.ne.s32.totalorder %s609_s10, %s605_s9 }
   0xc   : > { %s833_s17 = smov (%p35_p0, %s33_s17), 0  ;;  %p56_p5 = scmp.eq.s32.totalorder %s394_s15, 0 }
   0xd   : > { %p687_p4 = por %p50_p2, %p49_p1  ;;  %s37_s20 = ssub.s32 %s621_s13, %s833_s17 }
   0xe   : > { %p109_p6 = scmp.eq.s32.totalorder %s394_s15, 1  ;;  %p40_p7 = scmp.eq.s32.totalorder %s37_s20, 0 }
   0xf   : > { %p693_p8 = por %p56_p5, %p55_p3  ;;  %p115_p10 = scmp.eq.s32.totalorder %s395_s16, 1 }
  0x10   : > { %p697_p9 = por %p109_p6, %p49_p1  ;;  %p434_p13 = scmp.lt.s32.totalorder %s625_s14, 2 }
  0x11   : > { %s702_s23 = scalar_select %p40_p7, %s613_s11, %s42_s18  }
  0x12   : > { %p704_p11 = por %p115_p10, %p55_p3  ;;  %s711_s25 = sand.u32 1, %s613_s11  }
  0x13   : > { %s398_s26 = sshll.u32 %s711_s25, 2  ;;  %s413_s27 = sshll.u32 %s621_s13, 7 }
  0x14   : > { %s147_s30 = scalar_lea.hbm %s817_s0, %s413_s27  ;;  %s139_s3 = scalar_lea.vmem [#allocation2], %s398_s26 }
  0x15   : > { %s149_s4 = sshll.u32 %s139_s3, 4  ;;  %p720_p0 = pnand %p434_p13, %p687_p4  ;;  %s150_s4 = int_to_ptr.vmem [resolvable:$true] %s149_s4 }
  0x16   : > { %p404_p1 = scmp.ge.s32.totalorder %s625_s14, 1  ;;  %p175_p2 = scmp.lt.s32.totalorder %s625_s14, 3 }
  0x17   : > { %s136_s6 = scalar_lea.sflag [#allocation3], %s711_s25  ;;  %p487_p3 = pneg %p720_p0 }
  0x18   : > { %s498_s7 = scalar_lea.vmem %s150_s4, 64  ;;  %s627_s8 = smov [#allocation2]  }
  0x19   : > { %p499_p5 = scmp.ne.s32.totalorder %s150_s4, %s498_s7  ;;  %s503_s15 = sshll.u32 %s627_s8, 4  ;;  %s504_s15 = int_to_ptr.vmem [resolvable:$false] %s503_s15 }
  0x1a   : > { %s505_s16 = scalar_lea.vmem %s504_s15, 128  ;;  %p506_p4 = scmp.lt.s32.totalorder %s150_s4, %s504_s15 }
  0x1b   : > { %p501_p6 = pnand %p499_p5, %p487_p3  ;;  %p507_p10 = scmp.lt.s32.totalorder %s505_s16, %s498_s7 }
  0x1d   : > { %p502_p7 = pneg %p501_p6  ;;  %p508_p13 = por %p507_p10, %p506_p4 }
  0x1f   : > { %p509_p12 = pnand %p508_p13, %p502_p7 }
  0x21   : > { %512 = shalt.err (!%p509_p12)
}
  0x22   : > { %426 = dma.hbm_to_vmem [thread:$0]  (!%p720_p0), %s147_s30, 64, %s150_s4, %s136_s6  }
  0x23   : > { %p738_p5 = pnand %p404_p1, %p175_p2  ;;  %s401_s19 = sshll.u32 %s711_s25, 1 }
  0x24   : > { %s414_s20 = sshll.u32 %s621_s13, 5  ;;  %s160_s29 = scalar_lea.vmem [#allocation5], %s401_s19 }
  0x25   : > { %s168_s28 = scalar_lea.hbm %s818_s1, %s414_s20  ;;  %s170_s3 = sshll.u32 %s160_s29, 4  ;;  %s171_s3 = int_to_ptr.vmem [resolvable:$true] %s170_s3 }
  0x26   : > { %s157_s7 = scalar_lea.sflag [#allocation6], %s711_s25  ;;  %s526_s8 = scalar_lea.vmem %s171_s3, 32 }
  0x27   : > { %p527_p12 = scmp.ne.s32.totalorder %s171_s3, %s526_s8  ;;  %s628_s30 = smov [#allocation5]  }
  0x28   : > { %s531_s4 = sshll.u32 %s628_s30, 4  ;;  %s532_s4 = int_to_ptr.vmem [resolvable:$false] %s531_s4 }
  0x29   : > { %p529_p6 = pnand %p527_p12, %p487_p3  ;;  %s533_s6 = scalar_lea.vmem %s532_s4, 64 }
  0x2a   : > { %p534_p1 = scmp.lt.s32.totalorder %s171_s3, %s532_s4  ;;  %p535_p2 = scmp.lt.s32.totalorder %s533_s6, %s526_s8 }
  0x2b   : > { %p530_p7 = pneg %p529_p6 }
  0x2c   : > { %p536_p4 = por %p535_p2, %p534_p1 }
  0x2e   : > { %p537_p10 = pnand %p536_p4, %p530_p7 }
  0x30   : > { %540 = shalt.err (!%p537_p10)
}
  0x31   : > { %429 = dma.hbm_to_vmem [thread:$0]  (!%p720_p0), %s168_s28, 32, %s171_s3, %s157_s7  }
  0x32   : > { %179 = sbr.rel (%p738_p5) target bundleno = 298 (0x12a), region = 28  ;;  %s756_s25 = sand.u32 (!%p738_p5), 1, %s609_s10  }
  0x33   : > { %s405_s15 = sshll.u32 (!%p738_p5), %s756_s25, 2  ;;  %s182_s16 = scalar_lea.sflag (!%p738_p5), [#allocation3], %s756_s25 }
  0x34   : > { %s185_s19 = scalar_lea.vmem (!%p738_p5), [#allocation2], %s405_s15 }
  0x37   : > { %592 = dma.done.wait (%p693_p8), %s182_s16, 64  }
  0x38   : > { %594 = vsyncadd (%p693_p8), %s182_s16, 4294967232  ;;  %s406_s5 = sshll.u32 %s756_s25, 1  ;;  %s191_s18 = scalar_lea.sflag [#allocation6], %s756_s25 }
  0x39   : > { %s194_s20 = scalar_lea.vmem [#allocation5], %s406_s5 }
  0x3a   : > { %596 = dma.done.wait (%p693_p8), %s191_s18, 32  }
  0x3b   : > { %598 = vsyncadd (%p693_p8), %s191_s18, 4294967264  ;;  %v225_v0 = vlaneseq  ;;  %v629_v1 = vmov 1983009808   ;;  %v223_v7 = vld [vmem:[%s194_s20] sm:$0x3]  ;;  %vm256_vm0 = vcmask 1041408  }
  0x3c   : > { %v235_v2 = vunpack.c.l.s4 %v629_v1  ;;  %v222_v12 = vld [vmem:[%s185_s19] sm:$0xf]  ;;  %s407_s21 = sshll.u32 %s756_s25, 3  ;;  %s410_s28 = sshll.u32 %s617_s12, 7 }
  0x3d   : > { %v226_v3 = vshrl.u32 %v225_v0, 7  ;;  %s219_s26 = scalar_lea.vmem [#allocation7], %s407_s21  ;;  %s284_s8 = scalar_lea.hbm %s819_s2, %s410_s28 }
  0x3e   : > { %v236_v6 = vunpack.c.0.s8 %v235_v2  ;;  %s286_s27 = sshll.u32 %s219_s26, 4  ;;  %s272_s30 = scalar_lea.sflag [#allocation4], %s756_s25  ;;  %s772_s27 = int_to_ptr.vmem [resolvable:$true] %s286_s27 }
  0x3f   : > { %v227_v4 = vsub.s32 0, %v226_v3  ;;  %v231_v5 = vsub.s32 1, %v226_v3  ;;  %s541_s4 = scalar_lea.vmem %s772_s27, 128  ;;  %s630_s6 = smov [#allocation7]  }
  0x40   : > { %v239_v10 = vsub.s32 %v236_v6, %v226_v3  ;;  %p542_p8 = scmp.ne.s32.totalorder %s772_s27, %s541_s4  ;;  %s545_s12 = sshll.u32 %s630_s6, 4  ;;  %s546_s12 = int_to_ptr.vmem [resolvable:$false] %s545_s12 }
  0x41   : > { %v228_v8 = vrot.slane %v223_v7, %v227_v4  ;;  %v232_v9 = vrot.slane %v223_v7, %v231_v5  ;;  %s547_s15 = scalar_lea.vmem %s546_s12, 256  ;;  %p548_p13 = scmp.lt.s32.totalorder %s772_s27, %s546_s12 }
  0x42   : > { %p543_p0 = pnand %p542_p8, %p697_p9  ;;  %p549_p5 = scmp.lt.s32.totalorder %s547_s15, %s541_s4 }
  0x43   : > { %v233_v11 = vcombine.low %v228_v8, %v232_v9 }
  0x44   : > { %p544_p3 = pneg %p543_p0  ;;  %p550_p12 = por %p549_p5, %p548_p13 }
  0x45   : > { %v240_v13 = vrot.slane %v233_v11, %v239_v10 }
  0x46   : > { %p551_p6 = pnand %p550_p12, %p544_p3 }
  0x47   : > { %v242_v14 = vmul.f32 %v240_v13, %v222_v12 }
  0x49   : > { %v408_v15 = vadd.f32 -1.0, %v242_v14 }
  0x4b   : > { %v244_v16 = vmul.f32 %v408_v15, %v408_v15 }
  0x4d   : > { %v252_v17 = vrot.slane %v244_v16, %v239_v10 }
  0x4f   : > { %v253_v18 = vcombine.high %v252_v17, %v252_v17  ;;  %v257_v19 = vsel %vm256_vm0, %v252_v17, 0.0 }
  0x51   : > { %v258_v20 = vsel %vm256_vm0, %v253_v18, 0.0 }
  0x52   : > { %v259_v21 = vadd.f32 %v258_v20, %v257_v19 }
  0x54   : > { %260 = vadd.xlane.f32.xlu0 %v259_v21 }
  0xdd   : > { %v261_v22 = vpop.xlane.xlu0 %260 }
  0xde   : > { %v262_v23 = vrot.slane %v261_v22, 4 }
  0xe0   : > { %v263_v24 = vadd.f32 %v262_v23, %v261_v22 }
  0xe2   : > { %v264_v25 = vrot.slane %v263_v24, 2 }
  0xe4   : > { %v265_v26 = vadd.f32 %v264_v25, %v263_v24 }
  0xe6   : > { %v266_v27 = vrot.slane %v265_v26, 1 }
  0xe8   : > { %v267_v28 = vadd.f32 %v266_v27, %v265_v26 }
  0xea   : > { %415 = vpush %v267_v28 }
 0x11b   : > { %s416_s29 = spop %415 }
 0x11c   : > { %v269_v29 = vstv %s416_s29 }
 0x11d   : > { %270 = vst [vmem:[%s219_s26] sm:$0xff] %v269_v29 }
 0x11e   : > { %554 = shalt.err (!%p551_p6)
}
 0x11f   : > { %s555_s16 = scalar_lea.hbm %s284_s8, 128  ;;  %s559_s5 = scalar_lea.hbm %s819_s2, 256 }
 0x120   : > { %p556_p7 = scmp.ne.s32.totalorder %s284_s8, %s555_s16  ;;  %p560_p4 = scmp.lt.s32.totalorder %s284_s8, %s819_s2 }
 0x121   : > { %p561_p10 = scmp.lt.s32.totalorder %s559_s5, %s555_s16 }
 0x122   : > { %p557_p1 = pnand %p556_p7, %p697_p9 }
 0x123   : > { %p562_p8 = por %p561_p10, %p560_p4 }
 0x124   : > { %p558_p2 = pneg %p557_p1 }
 0x126   : > { %p563_p0 = pnand %p562_p8, %p558_p2 }
 0x128   : > { %566 = shalt.err (!%p563_p0)
}
 0x129   : > { %421 = dma.vmem_to_hbm [thread:$0]  (%p697_p9), %s772_s27, 128, %s284_s8, %s272_s30  }
 0x12a PF: > { %s298_s21 = sand.u32 1, %s605_s9   ;;  %p826_p3 = scmp.ge.s32.totalorder %s625_s14, 2 }
 0x12b   : > { %s299_s26 = scalar_lea.sflag [#allocation4], %s298_s21 }
 0x12c   : > { %p431_p13 = pnand %p826_p3, %p704_p11 }
 0x12e   : > { %p432_p5 = pneg %p431_p13 }
 0x130   : > { %600 = dma.done.wait (%p432_p5), %s299_s26, 128  }
 0x131   : > { %602 = vsyncadd (%p432_p5), %s299_s26, 4294967168  ;;  %s21_s14 = sadd.s32 1, %s625_s14   ;;  %s827_s9 = smov %s609_s10 }
 0x132   : > { %p18_p12 = scmp.ge.s32.totalorder %s21_s14, 4   ;;  %s828_s10 = smov %s613_s11 }
 0x133   : > { %s829_s11 = smov %s702_s23  ;;  %s830_s12 = smov %s621_s13 }
 0x134   : > { %s831_s13 = smov %s833_s17  ;;  %20 = sbr.rel (!%p18_p12) target bundleno = 8 (0x8), region = 86 }
 0x139   :  { %304 = vsyncpa [#allocation3], 1 }
 0x13a   :  { %306 = vsyncpa [#allocation3 + $0x1], 1 }
 0x13b   :  { %307 = vsyncpa [#allocation6], 1 }
 0x13c   :  { %309 = vsyncpa [#allocation6 + $0x1], 1 }
 0x13d   :  { %310 = vsyncpa [#allocation4], 1 }
 0x13e   :  { %312 = vsyncpa [#allocation4 + $0x1], 1 }

</bundles_post_ra>
